<compile_context>
chip_gen: v6e
topology: v6e:2x2x1
jax: 0.10.0
libtpu: 0.0.40
codegen_flags: <defaults>
</compile_context>

<pallas_src>
import jax
import jax.numpy as jnp
from jax.experimental import pallas as pl
from jax.experimental.pallas import tpu as pltpu

LANE = 128


def _round_up(n, m):
    return ((n + m - 1) // m) * m


def qnetwork_kernel(x_ref,
                    w1_ref, b1_ref,
                    w2_ref, b2_ref,
                    w3_ref, b3_ref,
                    w4_ref, b4_ref,
                    out_ref):
    # Layer 1: (TB, S)bf16 @ (S, 128)bf16 -> f32, bias + relu in f32.
    h = jnp.dot(x_ref[...], w1_ref[...], preferred_element_type=jnp.float32)
    h = jnp.maximum(h + b1_ref[...], 0.0)
    # Layer 2: (TB, 128) @ (128, 128)
    h = jnp.dot(h.astype(jnp.bfloat16), w2_ref[...],
                preferred_element_type=jnp.float32)
    h = jnp.maximum(h + b2_ref[...], 0.0)
    # Layer 3 (outputs zero-padded 64 -> 128 for lane-dense layout)
    h = jnp.dot(h.astype(jnp.bfloat16), w3_ref[...],
                preferred_element_type=jnp.float32)
    h = jnp.maximum(h + b3_ref[...], 0.0)
    # Layer 4 (no activation; outputs zero-padded action_size -> 128)
    q = jnp.dot(h.astype(jnp.bfloat16), w4_ref[...],
                preferred_element_type=jnp.float32)
    out_ref[...] = (q + b4_ref[...]).astype(out_ref.dtype)


def qnetwork_forward(x, params, *, tb_max=512):
    """x: (B, state_size) f32; params: dict of (W, b) with W=(in,out), b=(1,out)."""
    (w1, b1), (w2, b2), (w3, b3), (w4, b4) = (
        params["fc1"], params["fc2"], params["fc3"], params["fc4"])
    B, S = x.shape
    H1 = w1.shape[1]            # 128
    H2 = w2.shape[1]            # 128
    H3 = w3.shape[1]            # 64
    A = w4.shape[1]             # action_size

    # --- pad layer-3 / layer-4 to lane-dense (128-wide) columns -------------
    H3p = _round_up(H3, LANE)   # 128
    Ap = _round_up(A, LANE)     # 128
    w3p = jnp.pad(w3, ((0, 0), (0, H3p - H3)))
    b3p = jnp.pad(b3, ((0, 0), (0, H3p - H3)))
    w4p = jnp.pad(w4, ((0, H3p - H3), (0, Ap - A)))
    b4p = jnp.pad(b4, ((0, 0), (0, Ap - A)))

    # --- batch tiling (pad B up to a multiple of the tile) -------------------
    TB = min(tb_max, _round_up(B, 8))
    Bp = _round_up(B, TB)
    xp = jnp.pad(x, ((0, Bp - B), (0, 0)))

    # --- bf16 matmul operands, f32 biases ------------------------------------
    xb = xp.astype(jnp.bfloat16)
    w1b, w2b, w3b, w4b = (w1.astype(jnp.bfloat16), w2.astype(jnp.bfloat16),
                          w3p.astype(jnp.bfloat16), w4p.astype(jnp.bfloat16))
    b1f, b2f, b3f, b4f = (b1.astype(jnp.float32), b2.astype(jnp.float32),
                          b3p.astype(jnp.float32), b4p.astype(jnp.float32))

    grid = (Bp // TB,)

    # Weights/biases: same block for every grid step -> stay resident in VMEM.
    def resident(a):
        nd = a.ndim
        return pl.BlockSpec(a.shape, lambda i, _nd=nd: (0,) * _nd)

    flops = 2 * Bp * (S * H1 + H1 * H2 + H2 * H3p + H3p * Ap)
    bytes_accessed = (
        xb.size * 2 + Bp * Ap * 4
        + sum(w.size * 2 for w in (w1b, w2b, w3b, w4b))
        + sum(b.size * 4 for b in (b1f, b2f, b3f, b4f)))

    out = pl.pallas_call(
        qnetwork_kernel,
        out_shape=jax.ShapeDtypeStruct((Bp, Ap), jnp.float32),
        grid=grid,
        in_specs=[pl.BlockSpec((TB, S), lambda i: (i, 0)),
                  resident(w1b), resident(b1f),
                  resident(w2b), resident(b2f),
                  resident(w3b), resident(b3f),
                  resident(w4b), resident(b4f)],
        out_specs=pl.BlockSpec((TB, Ap), lambda i: (i, 0)),
        compiler_params=pltpu.CompilerParams(
            dimension_semantics=("parallel",),
            vmem_limit_bytes=64 * 1024 * 1024),
        cost_estimate=pl.CostEstimate(
            flops=flops, transcendentals=0, bytes_accessed=bytes_accessed),
    )(xb, w1b, b1f, w2b, b2f, w3b, b3f, w4b, b4f)

    return out[:B, :A]


def init_params(key, state_size, action_size):
    """Deterministic init mimicking nn.Linear default: U(-1/sqrt(fan_in), 1/sqrt(fan_in))."""
    dims = [(state_size, 128), (128, 128), (128, 64), (64, action_size)]
    names = ["fc1", "fc2", "fc3", "fc4"]
    params = {}
    for name, (fan_in, fan_out) in zip(names, dims):
        key, kw, kb = jax.random.split(key, 3)
        bound = 1.0 / jnp.sqrt(jnp.float32(fan_in))
        w = jax.random.uniform(kw, (fan_in, fan_out), jnp.float32, -bound, bound)
        b = jax.random.uniform(kb, (1, fan_out), jnp.float32, -bound, bound)
        params[name] = (w, b)
    return params


def reference_forward_f32(x, params):
    h = x
    for name in ["fc1", "fc2", "fc3"]:
        w, b = params[name]
        h = jnp.maximum(h @ w + b, 0.0)
    w, b = params["fc4"]
    return h @ w + b


def reference_forward_bf16(x, params):
    """Mirrors the kernel's bf16-operand / f32-accumulate arithmetic."""
    h = x.astype(jnp.bfloat16)
    for name in ["fc1", "fc2", "fc3"]:
        w, b = params[name]
        h = jnp.dot(h, w.astype(jnp.bfloat16), preferred_element_type=jnp.float32)
        h = jnp.maximum(h + b, 0.0).astype(jnp.bfloat16)
    w, b = params["fc4"]
    return jnp.dot(h, w.astype(jnp.bfloat16),
                   preferred_element_type=jnp.float32) + b


if __name__ == "__main__":
    key = jax.random.PRNGKey(0)
    batch, state_size, action_size = 32, 16, 4

    key, kx, kp = jax.random.split(key, 3)
    x = jax.random.normal(kx, (batch, state_size), jnp.float32)
    params = init_params(kp, state_size, action_size)

    out = qnetwork_forward(x, params)
    out = jax.block_until_ready(out)

    assert out.shape == (batch, action_size)

    # Tight check vs a reference that mirrors the bf16/f32 arithmetic.
    ref_bf16 = reference_forward_bf16(x, params)
    assert jnp.allclose(out, ref_bf16, atol=1e-3, rtol=1e-3), \
        "mismatch vs bf16-mirroring reference"

    # Loose check vs the pure-f32 PyTorch-equivalent math (bf16 operand rounding).
    ref_f32 = reference_forward_f32(x, params)
    assert jnp.allclose(out, ref_f32, atol=5e-2, rtol=5e-2), \
        "mismatch vs f32 reference"

    print("KERNEL_OK")
</pallas_src>

<mosaic_0001>
module attributes {stable_mosaic.version = 11 : i64} {
  func.func @qnetwork_kernel(%arg0: i32, %arg1: memref<32x16xbf16, #tpu.memory_space<vmem>>, %arg2: memref<16x128xbf16, #tpu.memory_space<vmem>>, %arg3: memref<1x128xf32, #tpu.memory_space<vmem>>, %arg4: memref<128x128xbf16, #tpu.memory_space<vmem>>, %arg5: memref<1x128xf32, #tpu.memory_space<vmem>>, %arg6: memref<128x128xbf16, #tpu.memory_space<vmem>>, %arg7: memref<1x128xf32, #tpu.memory_space<vmem>>, %arg8: memref<128x128xbf16, #tpu.memory_space<vmem>>, %arg9: memref<1x128xf32, #tpu.memory_space<vmem>>, %arg10: memref<32x128xf32, #tpu.memory_space<vmem>>) attributes {dimension_semantics = [#tpu.dimension_semantics<parallel>], iteration_bounds = array<i64: 1>, scalar_prefetch = 0 : i64, scratch_operands = 0 : i64, tpu.core_type = #tpu.core_type<tc>, window_params = [{transform_indices = @transform_0, window_bounds = array<i64: 32, 16>}, {pipeline_mode = #tpu.pipeline_mode<synchronous>, transform_indices = @transform_1, window_bounds = array<i64: 16, 128>}, {pipeline_mode = #tpu.pipeline_mode<synchronous>, transform_indices = @transform_2, window_bounds = array<i64: 1, 128>}, {pipeline_mode = #tpu.pipeline_mode<synchronous>, transform_indices = @transform_3, window_bounds = array<i64: 128, 128>}, {pipeline_mode = #tpu.pipeline_mode<synchronous>, transform_indices = @transform_4, window_bounds = array<i64: 1, 128>}, {pipeline_mode = #tpu.pipeline_mode<synchronous>, transform_indices = @transform_5, window_bounds = array<i64: 128, 128>}, {pipeline_mode = #tpu.pipeline_mode<synchronous>, transform_indices = @transform_6, window_bounds = array<i64: 1, 128>}, {pipeline_mode = #tpu.pipeline_mode<synchronous>, transform_indices = @transform_7, window_bounds = array<i64: 128, 128>}, {pipeline_mode = #tpu.pipeline_mode<synchronous>, transform_indices = @transform_8, window_bounds = array<i64: 1, 128>}, {transform_indices = @transform_9, window_bounds = array<i64: 32, 128>}]} {
    %c0 = arith.constant 0 : index
    %c0_0 = arith.constant 0 : index
    %0 = vector.load %arg1[%c0, %c0_0] : memref<32x16xbf16, #tpu.memory_space<vmem>>, vector<32x16xbf16>
    %c0_1 = arith.constant 0 : index
    %c0_2 = arith.constant 0 : index
    %1 = vector.load %arg2[%c0_1, %c0_2] : memref<16x128xbf16, #tpu.memory_space<vmem>>, vector<16x128xbf16>
    %cst = arith.constant dense<0.000000e+00> : vector<32x128xf32>
    %2 = tpu.matmul %0, %1, %cst {dimension_numbers = #tpu.dot_dimension_numbers<[1], [0], [0], [1], [0, 0, 1, 1], [], []>} : vector<32x16xbf16>, vector<16x128xbf16>, vector<32x128xf32> -> vector<32x128xf32>
    %c0_3 = arith.constant 0 : index
    %c0_4 = arith.constant 0 : index
    %3 = vector.load %arg3[%c0_3, %c0_4] : memref<1x128xf32, #tpu.memory_space<vmem>>, vector<1x128xf32>
    %4 = vector.broadcast %3 : vector<1x128xf32> to vector<32x128xf32>
    %5 = arith.addf %2, %4 : vector<32x128xf32>
    %cst_5 = arith.constant 0.000000e+00 : f32
    %6 = vector.broadcast %cst_5 : f32 to vector<32x128xf32>
    %7 = arith.maximumf %5, %6 : vector<32x128xf32>
    %8 = arith.truncf %7 : vector<32x128xf32> to vector<32x128xbf16>
    %c0_6 = arith.constant 0 : index
    %c0_7 = arith.constant 0 : index
    %9 = vector.load %arg4[%c0_6, %c0_7] : memref<128x128xbf16, #tpu.memory_space<vmem>>, vector<128x128xbf16>
    %cst_8 = arith.constant dense<0.000000e+00> : vector<32x128xf32>
    %10 = tpu.matmul %8, %9, %cst_8 {dimension_numbers = #tpu.dot_dimension_numbers<[1], [0], [0], [1], [0, 0, 1, 1], [], []>} : vector<32x128xbf16>, vector<128x128xbf16>, vector<32x128xf32> -> vector<32x128xf32>
    %c0_9 = arith.constant 0 : index
    %c0_10 = arith.constant 0 : index
    %11 = vector.load %arg5[%c0_9, %c0_10] : memref<1x128xf32, #tpu.memory_space<vmem>>, vector<1x128xf32>
    %12 = vector.broadcast %11 : vector<1x128xf32> to vector<32x128xf32>
    %13 = arith.addf %10, %12 : vector<32x128xf32>
    %cst_11 = arith.constant 0.000000e+00 : f32
    %14 = vector.broadcast %cst_11 : f32 to vector<32x128xf32>
    %15 = arith.maximumf %13, %14 : vector<32x128xf32>
    %16 = arith.truncf %15 : vector<32x128xf32> to vector<32x128xbf16>
    %c0_12 = arith.constant 0 : index
    %c0_13 = arith.constant 0 : index
    %17 = vector.load %arg6[%c0_12, %c0_13] : memref<128x128xbf16, #tpu.memory_space<vmem>>, vector<128x128xbf16>
    %cst_14 = arith.constant dense<0.000000e+00> : vector<32x128xf32>
    %18 = tpu.matmul %16, %17, %cst_14 {dimension_numbers = #tpu.dot_dimension_numbers<[1], [0], [0], [1], [0, 0, 1, 1], [], []>} : vector<32x128xbf16>, vector<128x128xbf16>, vector<32x128xf32> -> vector<32x128xf32>
    %c0_15 = arith.constant 0 : index
    %c0_16 = arith.constant 0 : index
    %19 = vector.load %arg7[%c0_15, %c0_16] : memref<1x128xf32, #tpu.memory_space<vmem>>, vector<1x128xf32>
    %20 = vector.broadcast %19 : vector<1x128xf32> to vector<32x128xf32>
    %21 = arith.addf %18, %20 : vector<32x128xf32>
    %cst_17 = arith.constant 0.000000e+00 : f32
    %22 = vector.broadcast %cst_17 : f32 to vector<32x128xf32>
    %23 = arith.maximumf %21, %22 : vector<32x128xf32>
    %24 = arith.truncf %23 : vector<32x128xf32> to vector<32x128xbf16>
    %c0_18 = arith.constant 0 : index
    %c0_19 = arith.constant 0 : index
    %25 = vector.load %arg8[%c0_18, %c0_19] : memref<128x128xbf16, #tpu.memory_space<vmem>>, vector<128x128xbf16>
    %cst_20 = arith.constant dense<0.000000e+00> : vector<32x128xf32>
    %26 = tpu.matmul %24, %25, %cst_20 {dimension_numbers = #tpu.dot_dimension_numbers<[1], [0], [0], [1], [0, 0, 1, 1], [], []>} : vector<32x128xbf16>, vector<128x128xbf16>, vector<32x128xf32> -> vector<32x128xf32>
    %c0_21 = arith.constant 0 : index
    %c0_22 = arith.constant 0 : index
    %27 = vector.load %arg9[%c0_21, %c0_22] : memref<1x128xf32, #tpu.memory_space<vmem>>, vector<1x128xf32>
    %28 = vector.broadcast %27 : vector<1x128xf32> to vector<32x128xf32>
    %29 = arith.addf %26, %28 : vector<32x128xf32>
    %c0_23 = arith.constant 0 : index
    %c0_24 = arith.constant 0 : index
    %30 = vector.load %arg10[%c0_23, %c0_24] : memref<32x128xf32, #tpu.memory_space<vmem>>, vector<32x128xf32>
    tpu.vector_store %arg10[%c0_23, %c0_24], %29 {strides = array<i32>} : memref<32x128xf32, #tpu.memory_space<vmem>>, vector<32x128xf32>,
    return
  }
  func.func @transform_0(%arg0: i32) -> (i32, i32) {
    %c0_i32 = arith.constant 0 : i32
    %c0_i32_0 = arith.constant 0 : i32
    return %arg0, %c0_i32 : i32, i32
  }
  func.func @transform_1(%arg0: i32) -> (i32, i32) {
    %c0_i32 = arith.constant 0 : i32
    %c0_i32_0 = arith.constant 0 : i32
    %c0_i32_1 = arith.constant 0 : i32
    return %c0_i32, %c0_i32_0 : i32, i32
  }
  func.func @transform_2(%arg0: i32) -> (i32, i32) {
    %c0_i32 = arith.constant 0 : i32
    %c0_i32_0 = arith.constant 0 : i32
    %c0_i32_1 = arith.constant 0 : i32
    return %c0_i32, %c0_i32_0 : i32, i32
  }
  func.func @transform_3(%arg0: i32) -> (i32, i32) {
    %c0_i32 = arith.constant 0 : i32
    %c0_i32_0 = arith.constant 0 : i32
    %c0_i32_1 = arith.constant 0 : i32
    return %c0_i32, %c0_i32_0 : i32, i32
  }
  func.func @transform_4(%arg0: i32) -> (i32, i32) {
    %c0_i32 = arith.constant 0 : i32
    %c0_i32_0 = arith.constant 0 : i32
    %c0_i32_1 = arith.constant 0 : i32
    return %c0_i32, %c0_i32_0 : i32, i32
  }
  func.func @transform_5(%arg0: i32) -> (i32, i32) {
    %c0_i32 = arith.constant 0 : i32
    %c0_i32_0 = arith.constant 0 : i32
    %c0_i32_1 = arith.constant 0 : i32
    return %c0_i32, %c0_i32_0 : i32, i32
  }
  func.func @transform_6(%arg0: i32) -> (i32, i32) {
    %c0_i32 = arith.constant 0 : i32
    %c0_i32_0 = arith.constant 0 : i32
    %c0_i32_1 = arith.constant 0 : i32
    return %c0_i32, %c0_i32_0 : i32, i32
  }
  func.func @transform_7(%arg0: i32) -> (i32, i32) {
    %c0_i32 = arith.constant 0 : i32
    %c0_i32_0 = arith.constant 0 : i32
    %c0_i32_1 = arith.constant 0 : i32
    return %c0_i32, %c0_i32_0 : i32, i32
  }
  func.func @transform_8(%arg0: i32) -> (i32, i32) {
    %c0_i32 = arith.constant 0 : i32
    %c0_i32_0 = arith.constant 0 : i32
    %c0_i32_1 = arith.constant 0 : i32
    return %c0_i32, %c0_i32_0 : i32, i32
  }
  func.func @transform_9(%arg0: i32) -> (i32, i32) {
    %c0_i32 = arith.constant 0 : i32
    %c0_i32_0 = arith.constant 0 : i32
    return %arg0, %c0_i32 : i32, i32
  }
}

</mosaic_0001>

<bundles_post_ra>
// kernel: tpu_custom_call.1
= control target key start
LH: loop header
LB: loop body
LE: loop exit
PB: predicated region body
PF: predicated region fallthrough
CT: control target
= control target key end

     0   :  { %14 = vsyncpa [#allocation3], 0  ;;  %s904_s0 = inlined_call_operand.vmem [shape: bf16[32,16], index: 0, kind: input, shape index: {}]   ;;  %s905_s1 = inlined_call_operand.vmem [shape: bf16[16,128], index: 1, kind: input, shape index: {}]   ;;  %s906_s2 = inlined_call_operand.vmem [shape: f32[1,128], index: 2, kind: input, shape index: {}]   ;;  %s907_s3 = inlined_call_operand.hbm [shape: bf16[128,128], index: 3, kind: input, shape index: {}]   ;;  %s908_s4 = inlined_call_operand.vmem [shape: f32[1,128], index: 4, kind: input, shape index: {}]   ;;  %s909_s5 = inlined_call_operand.hbm [shape: bf16[128,128], index: 5, kind: input, shape index: {}]   ;;  %s910_s6 = inlined_call_operand.vmem [shape: f32[1,128], index: 6, kind: input, shape index: {}]   ;;  %s911_s7 = inlined_call_operand.hbm [shape: bf16[128,128], index: 7, kind: input, shape index: {}]   ;;  %s912_s8 = inlined_call_operand.vmem [shape: f32[1,128], index: 8, kind: input, shape index: {}]   ;;  %s913_s9 = inlined_call_operand.hbm [shape: f32[32,128], index: 9, kind: output, shape index: {}]  }
   0x1   :  { %15 = vsyncpa [#allocation6], 0 }
   0x2   :  { %16 = vsyncpa [#allocation4], 0  ;;  %s813_s30 = smov [#allocation5]   ;;  %s814_s11 = smov [#allocation2]  }
   0x3   :  { %s42_s10 = sshll.u32 %s813_s30, 4  ;;  %s28_s12 = sshll.u32 %s814_s11, 4  ;;  %s43_s10 = int_to_ptr.vmem [resolvable:$true] %s42_s10  ;;  %s29_s12 = int_to_ptr.vmem [resolvable:$true] %s28_s12 }
   0x4   :  { %s735_s13 = scalar_lea.vmem %s43_s10, 1024  ;;  %p740_p1 = scmp.lt.s32.totalorder %s43_s10, %s43_s10 }
   0x5   :  { %p736_p0 = scmp.ne.s32.totalorder %s43_s10, %s735_s13  ;;  %p741_p2 = scmp.lt.s32.totalorder %s735_s13, %s735_s13 }
   0x7   :  { %p742_p3 = por %p741_p2, %p740_p1 }
   0x9   :  { %p743_p4 = pnand %p742_p3, %p736_p0 }
   0xb   :  { %746 = shalt.err (!%p743_p4)
}
   0xc   :  { %s815_s14 = smov 64   ;;  %s816_s15 = smov 4  }
   0xd   :  { %48 = dma.hbm_to_vmem [thread:$0]  %s909_s5, 1024, %s43_s10, [#allocation6], %s815_s14, %s815_s14, %s816_s15  }
   0xe   :  { %s755_s18 = scalar_lea.vmem %s29_s12, 1024  ;;  %p760_p6 = scmp.lt.s32.totalorder %s29_s12, %s29_s12 }
   0xf   :  { %p756_p5 = scmp.ne.s32.totalorder %s29_s12, %s755_s18  ;;  %p761_p7 = scmp.lt.s32.totalorder %s755_s18, %s755_s18 }
  0x11   :  { %p762_p8 = por %p761_p7, %p760_p6 }
  0x13   :  { %p763_p9 = pnand %p762_p8, %p756_p5 }
  0x15   :  { %766 = shalt.err (!%p763_p9)
}
  0x16   :  { %34 = dma.hbm_to_vmem [thread:$0]  %s907_s3, 1024, %s29_s12, [#allocation3], %s815_s14, %s815_s14, %s816_s15  }
  0x17   :  { %s817_s21 = smov [#allocation7]  }
  0x18   :  { %s56_s22 = sshll.u32 %s817_s21, 4  ;;  %s57_s22 = int_to_ptr.vmem [resolvable:$true] %s56_s22 }
  0x19   :  { %s775_s23 = scalar_lea.vmem %s57_s22, 1024  ;;  %p780_p11 = scmp.lt.s32.totalorder %s57_s22, %s57_s22 }
  0x1a   :  { %p776_p10 = scmp.ne.s32.totalorder %s57_s22, %s775_s23  ;;  %p781_p12 = scmp.lt.s32.totalorder %s775_s23, %s775_s23 }
  0x1c   :  { %p782_p13 = por %p781_p12, %p780_p11 }
  0x1e   :  { %p783_p0 = pnand %p782_p13, %p776_p10 }
  0x20   :  { %786 = shalt.err (!%p783_p0)
}
  0x21   :  { %62 = dma.hbm_to_vmem [thread:$0]  %s911_s7, 1024, %s57_s22, [#allocation6], %s815_s14, %s815_s14, %s816_s15  }
  0x22   :  { %807 = dma.done.wait [#allocation3], 1024  }
  0x23   :  { %808 = vsyncadd [#allocation3], 4294966272 }
  0x24   :  { %809 = dma.done.wait [#allocation6], 2048  }
  0x25   :  { %810 = vsyncadd [#allocation6], 4294965248  ;;  %v700_v0 = vld [vmem:[%s905_s1] sm:$0xff]   ;;  %vm104_vm0 = vcmask 130048   ;;  %v702_v2 = vld [vmem:[%s904_s0 + $0x8] sm:$0xff]  }
  0x26   :  { %v701_v1 = vld [vmem:[%s904_s0] sm:$0xff]   ;;  %626 = vmatprep.subr.bf16.mxu0 %v700_v0  ;;  %v703_v3 = vld [vmem:[#allocation2 + $0x38] sm:$0xff]   ;;  %v704_v4 = vld [vmem:[#allocation2 + $0x30] sm:$0xff]  }
  0x27   :  { %627 = vmatpush3.bf16.msra.mxu0 %v700_v0  ;;  %628 = vmatprep.mubr.msk.bf16.mxu0 %vm104_vm0, %v701_v1  ;;  %v705_v5 = vld [vmem:[#allocation2 + $0x28] sm:$0xff]   ;;  %v706_v6 = vld [vmem:[#allocation2 + $0x20] sm:$0xff]   ;;  %v707_v7 = vld [vmem:[#allocation2 + $0x18] sm:$0xff]  }
  0x28   :  { %632 = vmatprep.subr.bf16.mxu1 %v703_v3  ;;  %v708_v8 = vld [vmem:[#allocation2 + $0x10] sm:$0xff]   ;;  %v709_v9 = vld [vmem:[#allocation2 + $0x8] sm:$0xff]   ;;  %v710_v10 = vld [vmem:[#allocation2] sm:$0xff]  }
  0x29   :  { %633 = vmatpush3.bf16.msra.mxu1 %v703_v3  ;;  %v711_v11 = vld [vmem:[#allocation5 + $0x38] sm:$0xff]   ;;  %v712_v12 = vld [vmem:[#allocation5 + $0x30] sm:$0xff]   ;;  %v713_v13 = vld [vmem:[#allocation5 + $0x28] sm:$0xff]  }
  0x2a   :  { %629 = vmatmul.mubr.msk.bf16.vlgmr.msra.gmra.mxu0 %vm104_vm0, %v702_v2  ;;  %634 = vmatprep.subr.bf16.mxu1 %v704_v4  ;;  %v714_v14 = vld [vmem:[#allocation5 + $0x20] sm:$0xff]   ;;  %v715_v15 = vld [vmem:[#allocation5 + $0x18] sm:$0xff]   ;;  %v716_v31 = vld [vmem:[#allocation5 + $0x10] sm:$0xff]  }
  0x2b   :  { %652 = vmatprep.subr.bf16.mxu0 %v711_v11  ;;  %v560_v18 = vld [vmem:[%s906_s2] ss:$0 sm:$0xff]  ;;  %v717_v32 = vld [vmem:[#allocation5 + $0x8] sm:$0xff]   ;;  %v719_v34 = vld [vmem:[#allocation7 + $0x38] sm:$0xff]  }
  0x2c   :  { %653 = vmatpush3.bf16.msra.mxu0 %v711_v11  ;;  %v718_v33 = vld [vmem:[#allocation5] sm:$0xff]   ;;  %v720_v35 = vld [vmem:[#allocation7 + $0x30] sm:$0xff]   ;;  %v721_v36 = vld [vmem:[#allocation7 + $0x28] sm:$0xff]  }
  0x2d   :  { %635 = vmatpush3.bf16.msra.mxu1 %v704_v4  ;;  %654 = vmatprep.subr.bf16.mxu0 %v712_v12  ;;  %v722_v37 = vld [vmem:[#allocation7 + $0x20] sm:$0xff]   ;;  %v723_v38 = vld [vmem:[#allocation7 + $0x18] sm:$0xff]   ;;  %v724_v54 = vld [vmem:[#allocation7 + $0x10] sm:$0xff]  }
  0x2e   :  { %636 = vmatprep.subr.bf16.mxu1 %v705_v5  ;;  %v566_v41 = vld [vmem:[%s908_s4] ss:$0 sm:$0xff]  ;;  %v725_v55 = vld [vmem:[#allocation7 + $0x8] sm:$0xff]  }
  0x2f   :  { %v726_v56 = vld [vmem:[#allocation7] sm:$0xff]  }
  0x30   :  { %655 = vmatpush3.bf16.msra.mxu0 %v712_v12  ;;  %v575_v59 = vld [vmem:[%s910_s6] ss:$0 sm:$0xff]  ;;  %s818_s6 = smov [#allocation8]  }
  0x31   :  { %637 = vmatpush3.bf16.msra.mxu1 %v705_v5  ;;  %656 = vmatprep.subr.bf16.mxu0 %v713_v13  ;;  %s547_s12 = sshll.u32 %s818_s6, 4  ;;  %s548_s12 = int_to_ptr.vmem [resolvable:$true] %s547_s12 }
  0x32   :  { %638 = vmatprep.subr.bf16.mxu1 %v706_v6  ;;  %s787_s13 = scalar_lea.vmem %s548_s12, 512  ;;  %p792_p2 = scmp.lt.s32.totalorder %s548_s12, %s548_s12 }
  0x33   :  { %p788_p1 = scmp.ne.s32.totalorder %s548_s12, %s787_s13  ;;  %p793_p3 = scmp.lt.s32.totalorder %s787_s13, %s787_s13 }
  0x34   :  { %657 = vmatpush3.bf16.msra.mxu0 %v713_v13 }
  0x35   :  { %639 = vmatpush3.bf16.msra.mxu1 %v706_v6  ;;  %658 = vmatprep.subr.bf16.mxu0 %v714_v14  ;;  %p794_p4 = por %p793_p3, %p792_p2 }
  0x36   :  { %640 = vmatprep.subr.bf16.mxu1 %v707_v7 }
  0x37   :  { %p795_p5 = pnand %p794_p4, %p788_p1 }
  0x38   :  { %659 = vmatpush3.bf16.msra.mxu0 %v714_v14 }
  0x39   :  { %641 = vmatpush3.bf16.msra.mxu1 %v707_v7  ;;  %660 = vmatprep.subr.bf16.mxu0 %v715_v15 }
  0x3a   :  { %642 = vmatprep.subr.bf16.mxu1 %v708_v8 }
  0x3c   :  { %661 = vmatpush3.bf16.msra.mxu0 %v715_v15 }
  0x3d   :  { %643 = vmatpush3.bf16.msra.mxu1 %v708_v8  ;;  %662 = vmatprep.subr.bf16.mxu0 %v716_v31  ;;  %v584_v8 = vld [vmem:[%s912_s8] ss:$0 sm:$0xff] }
  0x3e   :  { %644 = vmatprep.subr.bf16.mxu1 %v709_v9 }
  0x40   :  { %663 = vmatpush3.bf16.msra.mxu0 %v716_v31 }
  0x41   :  { %645 = vmatpush3.bf16.msra.mxu1 %v709_v9  ;;  %664 = vmatprep.subr.bf16.mxu0 %v717_v32 }
  0x42   :  { %646 = vmatprep.subr.bf16.mxu1 %v710_v10 }
  0x44   :  { %665 = vmatpush3.bf16.msra.mxu0 %v717_v32 }
  0x45   :  { %647 = vmatpush3.bf16.msra.mxu1 %v710_v10  ;;  %666 = vmatprep.subr.bf16.mxu0 %v718_v33 }
  0x46   :  { %672 = vmatprep.subr.bf16.mxu1 %v719_v34 }
  0x48   :  { %667 = vmatpush3.bf16.msra.mxu0 %v718_v33 }
  0xea   :  { %v630_v16 = vpop.f32.mrf.mxu0 }
  0xeb   :  { %v154_v22 = vadd.f32 %v630_v16, %v560_v18 }
  0xec   :  { %v145_v17 = vpop.f32.mrf.mxu0 }
  0xed   :  { %v146_v20 = vadd.f32 %v560_v18, %v145_v17  ;;  %v162_v28 = vmax.f32 %v154_v22, 0.0 }
  0xee   :  { %v631_v19 = vpop.f32.mrf.mxu0 }
  0xef   :  { %v157_v21 = vadd.f32 %v631_v19, %v560_v18  ;;  %v160_v26 = vmax.f32 %v146_v20, 0.0 }
  0xf0   :  { %v148_v23 = vpop.f32.mrf.mxu0 }
  0xf1   :  { %v149_v24 = vadd.f32 %v560_v18, %v148_v23  ;;  %v163_v25 = vmax.f32 %v157_v21, 0.0 }
  0xf3   :  { %v161_v27 = vmax.f32 %v149_v24, 0.0  ;;  %v165_v30 = vpack.c.bf16 %v163_v25, %v162_v28 }
  0xf5   :  { %v164_v29 = vpack.c.bf16 %v161_v27, %v160_v26 }
  0xf7   :  { %648 = vmatprep.mubr.bf16.mxu1 %v164_v29 }
  0xf8   :  { %649 = vmatmul.mubr.bf16.vlgmr.msra.gmra.mxu1 %v165_v30 }
  0xf9   :  { %673 = vmatpush3.bf16.msra.mxu1 %v719_v34 }
  0xfa   :  { %674 = vmatprep.subr.bf16.mxu1 %v720_v35 }
  0xfd   :  { %675 = vmatpush3.bf16.msra.mxu1 %v720_v35 }
  0xfe   :  { %676 = vmatprep.subr.bf16.mxu1 %v721_v36 }
 0x101   :  { %677 = vmatpush3.bf16.msra.mxu1 %v721_v36 }
 0x102   :  { %678 = vmatprep.subr.bf16.mxu1 %v722_v37 }
 0x105   :  { %679 = vmatpush3.bf16.msra.mxu1 %v722_v37 }
 0x106   :  { %680 = vmatprep.subr.bf16.mxu1 %v723_v38 }
 0x109   :  { %681 = vmatpush3.bf16.msra.mxu1 %v723_v38 }
 0x10a   :  { %682 = vmatprep.subr.bf16.mxu1 %v724_v54 }
 0x10d   :  { %683 = vmatpush3.bf16.msra.mxu1 %v724_v54 }
 0x10e   :  { %684 = vmatprep.subr.bf16.mxu1 %v725_v55 }
 0x111   :  { %685 = vmatpush3.bf16.msra.mxu1 %v725_v55 }
 0x112   :  { %686 = vmatprep.subr.bf16.mxu1 %v726_v56 }
 0x115   :  { %687 = vmatpush3.bf16.msra.mxu1 %v726_v56 }
 0x1b8   :  { %v650_v39 = vpop.f32.mrf.mxu1 }
 0x1b9   :  { %v280_v45 = vadd.f32 %v650_v39, %v566_v41 }
 0x1ba   :  { %v271_v40 = vpop.f32.mrf.mxu1 }
 0x1bb   :  { %v272_v43 = vadd.f32 %v566_v41, %v271_v40  ;;  %v288_v51 = vmax.f32 %v280_v45, 0.0 }
 0x1bc   :  { %v651_v42 = vpop.f32.mrf.mxu1 }
 0x1bd   :  { %v283_v44 = vadd.f32 %v651_v42, %v566_v41  ;;  %v286_v49 = vmax.f32 %v272_v43, 0.0 }
 0x1be   :  { %v274_v46 = vpop.f32.mrf.mxu1 }
 0x1bf   :  { %v275_v47 = vadd.f32 %v566_v41, %v274_v46  ;;  %v289_v48 = vmax.f32 %v283_v44, 0.0 }
 0x1c1   :  { %v287_v50 = vmax.f32 %v275_v47, 0.0  ;;  %v291_v53 = vpack.c.bf16 %v289_v48, %v288_v51 }
 0x1c3   :  { %v290_v52 = vpack.c.bf16 %v287_v50, %v286_v49 }
 0x1c5   :  { %668 = vmatprep.mubr.bf16.mxu0 %v290_v52 }
 0x1c6   :  { %669 = vmatmul.mubr.bf16.vlgmr.msra.gmra.mxu0 %v291_v53 }
 0x286   :  { %v670_v57 = vpop.f32.mrf.mxu0 }
 0x287   :  { %v406_v63 = vadd.f32 %v670_v57, %v575_v59 }
 0x288   :  { %v397_v58 = vpop.f32.mrf.mxu0 }
 0x289   :  { %v398_v61 = vadd.f32 %v575_v59, %v397_v58  ;;  %v414_v5 = vmax.f32 %v406_v63, 0.0 }
 0x28a   :  { %v671_v60 = vpop.f32.mrf.mxu0 }
 0x28b   :  { %v409_v62 = vadd.f32 %v671_v60, %v575_v59  ;;  %v412_v3 = vmax.f32 %v398_v61, 0.0 }
 0x28c   :  { %v400_v0 = vpop.f32.mrf.mxu0 }
 0x28d   :  { %v401_v1 = vadd.f32 %v575_v59, %v400_v0  ;;  %v415_v2 = vmax.f32 %v409_v62, 0.0 }
 0x28f   :  { %v413_v4 = vmax.f32 %v401_v1, 0.0  ;;  %v417_v7 = vpack.c.bf16 %v415_v2, %v414_v5 }
 0x291   :  { %v416_v6 = vpack.c.bf16 %v413_v4, %v412_v3 }
 0x293   :  { %688 = vmatprep.mubr.bf16.mxu1 %v416_v6 }
 0x294   :  { %689 = vmatmul.mubr.bf16.vlgmr.msra.gmra.mxu1 %v417_v7 }
 0x354   :  { %v690_v9 = vpop.f32.mrf.mxu1 }
 0x355   :  { %v532_v10 = vadd.f32 %v690_v9, %v584_v8 }
 0x356   :  { %v523_v11 = vpop.f32.mrf.mxu1 }
 0x357   :  { %540 = vst [vmem:[#allocation8 + $0x10] sm:$0xff] %v532_v10  ;;  %v524_v12 = vadd.f32 %v584_v8, %v523_v11 }
 0x358   :  { %v691_v13 = vpop.f32.mrf.mxu1 }
 0x359   :  { %538 = vst [vmem:[#allocation8] sm:$0xff] %v524_v12  ;;  %v535_v14 = vadd.f32 %v691_v13, %v584_v8 }
 0x35a   :  { %v526_v15 = vpop.f32.mrf.mxu1 }
 0x35b   :  { %541 = vst [vmem:[#allocation8 + $0x18] sm:$0xff] %v535_v14  ;;  %v527_v16 = vadd.f32 %v584_v8, %v526_v15 }
 0x35d   :  { %539 = vst [vmem:[#allocation8 + $0x8] sm:$0xff] %v527_v16 }
 0x35e   :  { %798 = shalt.err (!%p795_p5)
}
 0x35f   :  { %s819_s8 = smov 128   ;;  %s820_s14 = smov 8  }
 0x360   :  { %553 = dma.vmem_to_hbm [thread:$0]  %s548_s12, 512, %s913_s9, [#allocation4], %s819_s8, %s819_s8, %s820_s14  }
 0x361   :  { %811 = dma.done.wait [#allocation4], 512  }
 0x362   :  { %812 = vsyncadd [#allocation4], 4294966784 }
 0x363   :  { %557 = vsyncpa [#allocation3], 1 }
 0x364   :  { %558 = vsyncpa [#allocation6], 1 }
 0x365   :  { %559 = vsyncpa [#allocation4], 1 }

</bundles_post_ra>
